<compile_context>
chip_gen: v6e
topology: v6e:2x2x1
jax: 0.10.0
libtpu: 0.0.40
codegen_flags: <defaults>
</compile_context>

<pallas_src>
import jax
import jax.numpy as jnp
from jax.experimental import pallas as pl
from jax.experimental.pallas import tpu as pltpu

MIN_VALUE = 12.0
MAX_VALUE = 33.0


def _convt_clamp_kernel(x_ref, w_ref, b_ref, o_ref):
    # x_ref: (N, Cin, H, W)   VMEM
    # w_ref: (Cin, Cout)      SMEM  (PyTorch ConvTranspose2d weight, k=1 squeezed)
    # b_ref: (Cout,)          SMEM
    # o_ref: (N, Cout, H-2, W-2) VMEM  — final, already-cropped output.
    n, cin, h, w = x_ref.shape
    cout = o_ref.shape[1]

    for b in range(n):                       # N = 2, static unroll
        # Load the cropped interior of every input channel once per batch.
        xc = [x_ref[b, k, 1:h - 1, 1:w - 1] for k in range(cin)]   # (H-2, W-2) each
        for o in range(cout):                # Cout = 8, static unroll
            # Scalar-from-SMEM broadcast FMAs on the VPU; bias folded in.
            acc = b_ref[o] + w_ref[0, o] * xc[0]
            for k in range(1, cin):          # Cin = 3, static unroll
                acc = acc + w_ref[k, o] * xc[k]
            o_ref[b, o] = jnp.clip(acc, MIN_VALUE, MAX_VALUE).astype(o_ref.dtype)


@jax.jit
def conv_transpose_1x1_p1_clamp(x_nchw, weight, bias):
    """x_nchw: (N, Cin, H, W); weight: (Cin, Cout, 1, 1) [PyTorch layout]; bias: (Cout,)."""
    n, cin, h, w = x_nchw.shape
    cout = weight.shape[1]
    hout, wout = h - 2, w - 2                # k=1, s=1, p=1 transposed conv

    w2 = weight.reshape(cin, cout)           # free reshape, fused under this jit

    out = pl.pallas_call(
        _convt_clamp_kernel,
        out_shape=jax.ShapeDtypeStruct((n, cout, hout, wout), jnp.float32),
        in_specs=[
            pl.BlockSpec(memory_space=pltpu.MemorySpace.VMEM),   # x: whole array in VMEM
            pl.BlockSpec(memory_space=pltpu.MemorySpace.SMEM),   # weight scalars
            pl.BlockSpec(memory_space=pltpu.MemorySpace.SMEM),   # bias scalars
        ],
        out_specs=pl.BlockSpec(memory_space=pltpu.MemorySpace.VMEM),
        cost_estimate=pl.CostEstimate(
            flops=2 * n * cin * cout * hout * wout,
            transcendentals=0,
            bytes_accessed=4 * (n * cin * h * w + n * cout * hout * wout
                                + cin * cout + cout),
        ),
    )(x_nchw, w2, bias)
    return out


def reference(x_nchw, weight, bias):
    # Pure-JAX reference: ConvTranspose2d(k=1, s=1, p=1) == crop + pointwise mix.
    n, cin, h, w = x_nchw.shape
    cout = weight.shape[1]
    x_crop = x_nchw[:, :, 1:-1, 1:-1]
    y = jnp.einsum("nchw,co->nohw", x_crop, weight.reshape(cin, cout))
    y = y + bias.reshape(1, cout, 1, 1)
    return jnp.clip(y, MIN_VALUE, MAX_VALUE)


if __name__ == "__main__":
    key = jax.random.PRNGKey(0)
    kx, kw, kb = jax.random.split(key, 3)

    # Small shapes consistent with the module: NCHW, Cin=3 (required by the conv).
    x = jax.random.normal(kx, (2, 3, 16, 16), dtype=jnp.float32)

    # Deterministic ConvTranspose2d-style init (weight layout: (Cin, Cout, 1, 1)).
    fan_in = 3 * 1 * 1
    bound = 1.0 / (fan_in ** 0.5)
    weight = jax.random.uniform(kw, (3, 8, 1, 1), jnp.float32, -bound, bound)
    bias = jax.random.uniform(kb, (8,), jnp.float32, -bound, bound)

    out = conv_transpose_1x1_p1_clamp(x, weight, bias)
    out = jax.block_until_ready(out)

    ref = reference(x, weight, bias)
    assert out.shape == (2, 8, 14, 14), out.shape
    assert jnp.allclose(out, ref, atol=1e-5, rtol=1e-5)

    print("KERNEL_OK")
</pallas_src>

<mosaic_0001>
module attributes {stable_mosaic.version = 11 : i64} {
  func.func @_convt_clamp_kernel(%arg0: memref<2x3x16x16xf32, #tpu.memory_space<vmem>>, %arg1: memref<3x8xf32, #tpu.memory_space<smem>>, %arg2: memref<8xf32, #tpu.memory_space<smem>>, %arg3: memref<2x8x14x14xf32, #tpu.memory_space<vmem>>) attributes {dimension_semantics = [], scalar_prefetch = 0 : i64, scratch_operands = 0 : i64, tpu.core_type = #tpu.core_type<tc>} {
    %c0 = arith.constant 0 : index
    %c0_0 = arith.constant 0 : index
    %c1 = arith.constant 1 : index
    %c1_1 = arith.constant 1 : index
    %0 = vector.load %arg0[%c0, %c0_0, %c1, %c1_1] : memref<2x3x16x16xf32, #tpu.memory_space<vmem>>, vector<1x1x14x14xf32>
    %1 = vector.shape_cast %0 : vector<1x1x14x14xf32> to vector<14x14xf32>
    %c0_2 = arith.constant 0 : index
    %c1_3 = arith.constant 1 : index
    %c1_4 = arith.constant 1 : index
    %c1_5 = arith.constant 1 : index
    %2 = vector.load %arg0[%c0_2, %c1_3, %c1_4, %c1_5] : memref<2x3x16x16xf32, #tpu.memory_space<vmem>>, vector<1x1x14x14xf32>
    %3 = vector.shape_cast %2 : vector<1x1x14x14xf32> to vector<14x14xf32>
    %c0_6 = arith.constant 0 : index
    %c2 = arith.constant 2 : index
    %c1_7 = arith.constant 1 : index
    %c1_8 = arith.constant 1 : index
    %4 = vector.load %arg0[%c0_6, %c2, %c1_7, %c1_8] : memref<2x3x16x16xf32, #tpu.memory_space<vmem>>, vector<1x1x14x14xf32>
    %5 = vector.shape_cast %4 : vector<1x1x14x14xf32> to vector<14x14xf32>
    %c0_9 = arith.constant 0 : index
    %6 = memref.load %arg2[%c0_9] : memref<8xf32, #tpu.memory_space<smem>>
    %c0_10 = arith.constant 0 : index
    %c0_11 = arith.constant 0 : index
    %7 = memref.load %arg1[%c0_10, %c0_11] : memref<3x8xf32, #tpu.memory_space<smem>>
    %8 = vector.broadcast %7 : f32 to vector<14x14xf32>
    %9 = arith.mulf %8, %1 : vector<14x14xf32>
    %10 = vector.broadcast %6 : f32 to vector<14x14xf32>
    %11 = arith.addf %10, %9 : vector<14x14xf32>
    %c1_12 = arith.constant 1 : index
    %c0_13 = arith.constant 0 : index
    %12 = memref.load %arg1[%c1_12, %c0_13] : memref<3x8xf32, #tpu.memory_space<smem>>
    %13 = vector.broadcast %12 : f32 to vector<14x14xf32>
    %14 = arith.mulf %13, %3 : vector<14x14xf32>
    %15 = arith.addf %11, %14 : vector<14x14xf32>
    %c2_14 = arith.constant 2 : index
    %c0_15 = arith.constant 0 : index
    %16 = memref.load %arg1[%c2_14, %c0_15] : memref<3x8xf32, #tpu.memory_space<smem>>
    %17 = vector.broadcast %16 : f32 to vector<14x14xf32>
    %18 = arith.mulf %17, %5 : vector<14x14xf32>
    %19 = arith.addf %15, %18 : vector<14x14xf32>
    %cst = arith.constant 1.200000e+01 : f32
    %cst_16 = arith.constant 3.300000e+01 : f32
    %20 = vector.broadcast %cst : f32 to vector<14x14xf32>
    %21 = arith.maximumf %20, %19 : vector<14x14xf32>
    %22 = vector.broadcast %cst_16 : f32 to vector<14x14xf32>
    %23 = arith.minimumf %22, %21 : vector<14x14xf32>
    %c0_17 = arith.constant 0 : index
    %c0_18 = arith.constant 0 : index
    %c0_19 = arith.constant 0 : index
    %c0_20 = arith.constant 0 : index
    %24 = vector.load %arg3[%c0_17, %c0_18, %c0_19, %c0_20] : memref<2x8x14x14xf32, #tpu.memory_space<vmem>>, vector<1x1x14x14xf32>
    %25 = vector.shape_cast %24 : vector<1x1x14x14xf32> to vector<14x14xf32>
    %26 = vector.shape_cast %23 : vector<14x14xf32> to vector<1x1x14x14xf32>
    tpu.vector_store %arg3[%c0_17, %c0_18, %c0_19, %c0_20], %26 {strides = array<i32>} : memref<2x8x14x14xf32, #tpu.memory_space<vmem>>, vector<1x1x14x14xf32>,
    %c1_21 = arith.constant 1 : index
    %27 = memref.load %arg2[%c1_21] : memref<8xf32, #tpu.memory_space<smem>>
    %c0_22 = arith.constant 0 : index
    %c1_23 = arith.constant 1 : index
    %28 = memref.load %arg1[%c0_22, %c1_23] : memref<3x8xf32, #tpu.memory_space<smem>>
    %29 = vector.broadcast %28 : f32 to vector<14x14xf32>
    %30 = arith.mulf %29, %1 : vector<14x14xf32>
    %31 = vector.broadcast %27 : f32 to vector<14x14xf32>
    %32 = arith.addf %31, %30 : vector<14x14xf32>
    %c1_24 = arith.constant 1 : index
    %c1_25 = arith.constant 1 : index
    %33 = memref.load %arg1[%c1_24, %c1_25] : memref<3x8xf32, #tpu.memory_space<smem>>
    %34 = vector.broadcast %33 : f32 to vector<14x14xf32>
    %35 = arith.mulf %34, %3 : vector<14x14xf32>
    %36 = arith.addf %32, %35 : vector<14x14xf32>
    %c2_26 = arith.constant 2 : index
    %c1_27 = arith.constant 1 : index
    %37 = memref.load %arg1[%c2_26, %c1_27] : memref<3x8xf32, #tpu.memory_space<smem>>
    %38 = vector.broadcast %37 : f32 to vector<14x14xf32>
    %39 = arith.mulf %38, %5 : vector<14x14xf32>
    %40 = arith.addf %36, %39 : vector<14x14xf32>
    %cst_28 = arith.constant 1.200000e+01 : f32
    %cst_29 = arith.constant 3.300000e+01 : f32
    %41 = vector.broadcast %cst_28 : f32 to vector<14x14xf32>
    %42 = arith.maximumf %41, %40 : vector<14x14xf32>
    %43 = vector.broadcast %cst_29 : f32 to vector<14x14xf32>
    %44 = arith.minimumf %43, %42 : vector<14x14xf32>
    %c0_30 = arith.constant 0 : index
    %c1_31 = arith.constant 1 : index
    %c0_32 = arith.constant 0 : index
    %c0_33 = arith.constant 0 : index
    %45 = vector.load %arg3[%c0_30, %c1_31, %c0_32, %c0_33] : memref<2x8x14x14xf32, #tpu.memory_space<vmem>>, vector<1x1x14x14xf32>
    %46 = vector.shape_cast %45 : vector<1x1x14x14xf32> to vector<14x14xf32>
    %47 = vector.shape_cast %44 : vector<14x14xf32> to vector<1x1x14x14xf32>
    tpu.vector_store %arg3[%c0_30, %c1_31, %c0_32, %c0_33], %47 {strides = array<i32>} : memref<2x8x14x14xf32, #tpu.memory_space<vmem>>, vector<1x1x14x14xf32>,
    %c2_34 = arith.constant 2 : index
    %48 = memref.load %arg2[%c2_34] : memref<8xf32, #tpu.memory_space<smem>>
    %c0_35 = arith.constant 0 : index
    %c2_36 = arith.constant 2 : index
    %49 = memref.load %arg1[%c0_35, %c2_36] : memref<3x8xf32, #tpu.memory_space<smem>>
    %50 = vector.broadcast %49 : f32 to vector<14x14xf32>
    %51 = arith.mulf %50, %1 : vector<14x14xf32>
    %52 = vector.broadcast %48 : f32 to vector<14x14xf32>
    %53 = arith.addf %52, %51 : vector<14x14xf32>
    %c1_37 = arith.constant 1 : index
    %c2_38 = arith.constant 2 : index
    %54 = memref.load %arg1[%c1_37, %c2_38] : memref<3x8xf32, #tpu.memory_space<smem>>
    %55 = vector.broadcast %54 : f32 to vector<14x14xf32>
    %56 = arith.mulf %55, %3 : vector<14x14xf32>
    %57 = arith.addf %53, %56 : vector<14x14xf32>
    %c2_39 = arith.constant 2 : index
    %c2_40 = arith.constant 2 : index
    %58 = memref.load %arg1[%c2_39, %c2_40] : memref<3x8xf32, #tpu.memory_space<smem>>
    %59 = vector.broadcast %58 : f32 to vector<14x14xf32>
    %60 = arith.mulf %59, %5 : vector<14x14xf32>
    %61 = arith.addf %57, %60 : vector<14x14xf32>
    %cst_41 = arith.constant 1.200000e+01 : f32
    %cst_42 = arith.constant 3.300000e+01 : f32
    %62 = vector.broadcast %cst_41 : f32 to vector<14x14xf32>
    %63 = arith.maximumf %62, %61 : vector<14x14xf32>
    %64 = vector.broadcast %cst_42 : f32 to vector<14x14xf32>
    %65 = arith.minimumf %64, %63 : vector<14x14xf32>
    %c0_43 = arith.constant 0 : index
    %c2_44 = arith.constant 2 : index
    %c0_45 = arith.constant 0 : index
    %c0_46 = arith.constant 0 : index
    %66 = vector.load %arg3[%c0_43, %c2_44, %c0_45, %c0_46] : memref<2x8x14x14xf32, #tpu.memory_space<vmem>>, vector<1x1x14x14xf32>
    %67 = vector.shape_cast %66 : vector<1x1x14x14xf32> to vector<14x14xf32>
    %68 = vector.shape_cast %65 : vector<14x14xf32> to vector<1x1x14x14xf32>
    tpu.vector_store %arg3[%c0_43, %c2_44, %c0_45, %c0_46], %68 {strides = array<i32>} : memref<2x8x14x14xf32, #tpu.memory_space<vmem>>, vector<1x1x14x14xf32>,
    %c3 = arith.constant 3 : index
    %69 = memref.load %arg2[%c3] : memref<8xf32, #tpu.memory_space<smem>>
    %c0_47 = arith.constant 0 : index
    %c3_48 = arith.constant 3 : index
    %70 = memref.load %arg1[%c0_47, %c3_48] : memref<3x8xf32, #tpu.memory_space<smem>>
    %71 = vector.broadcast %70 : f32 to vector<14x14xf32>
    %72 = arith.mulf %71, %1 : vector<14x14xf32>
    %73 = vector.broadcast %69 : f32 to vector<14x14xf32>
    %74 = arith.addf %73, %72 : vector<14x14xf32>
    %c1_49 = arith.constant 1 : index
    %c3_50 = arith.constant 3 : index
    %75 = memref.load %arg1[%c1_49, %c3_50] : memref<3x8xf32, #tpu.memory_space<smem>>
    %76 = vector.broadcast %75 : f32 to vector<14x14xf32>
    %77 = arith.mulf %76, %3 : vector<14x14xf32>
    %78 = arith.addf %74, %77 : vector<14x14xf32>
    %c2_51 = arith.constant 2 : index
    %c3_52 = arith.constant 3 : index
    %79 = memref.load %arg1[%c2_51, %c3_52] : memref<3x8xf32, #tpu.memory_space<smem>>
    %80 = vector.broadcast %79 : f32 to vector<14x14xf32>
    %81 = arith.mulf %80, %5 : vector<14x14xf32>
    %82 = arith.addf %78, %81 : vector<14x14xf32>
    %cst_53 = arith.constant 1.200000e+01 : f32
    %cst_54 = arith.constant 3.300000e+01 : f32
    %83 = vector.broadcast %cst_53 : f32 to vector<14x14xf32>
    %84 = arith.maximumf %83, %82 : vector<14x14xf32>
    %85 = vector.broadcast %cst_54 : f32 to vector<14x14xf32>
    %86 = arith.minimumf %85, %84 : vector<14x14xf32>
    %c0_55 = arith.constant 0 : index
    %c3_56 = arith.constant 3 : index
    %c0_57 = arith.constant 0 : index
    %c0_58 = arith.constant 0 : index
    %87 = vector.load %arg3[%c0_55, %c3_56, %c0_57, %c0_58] : memref<2x8x14x14xf32, #tpu.memory_space<vmem>>, vector<1x1x14x14xf32>
    %88 = vector.shape_cast %87 : vector<1x1x14x14xf32> to vector<14x14xf32>
    %89 = vector.shape_cast %86 : vector<14x14xf32> to vector<1x1x14x14xf32>
    tpu.vector_store %arg3[%c0_55, %c3_56, %c0_57, %c0_58], %89 {strides = array<i32>} : memref<2x8x14x14xf32, #tpu.memory_space<vmem>>, vector<1x1x14x14xf32>,
    %c4 = arith.constant 4 : index
    %90 = memref.load %arg2[%c4] : memref<8xf32, #tpu.memory_space<smem>>
    %c0_59 = arith.constant 0 : index
    %c4_60 = arith.constant 4 : index
    %91 = memref.load %arg1[%c0_59, %c4_60] : memref<3x8xf32, #tpu.memory_space<smem>>
    %92 = vector.broadcast %91 : f32 to vector<14x14xf32>
    %93 = arith.mulf %92, %1 : vector<14x14xf32>
    %94 = vector.broadcast %90 : f32 to vector<14x14xf32>
    %95 = arith.addf %94, %93 : vector<14x14xf32>
    %c1_61 = arith.constant 1 : index
    %c4_62 = arith.constant 4 : index
    %96 = memref.load %arg1[%c1_61, %c4_62] : memref<3x8xf32, #tpu.memory_space<smem>>
    %97 = vector.broadcast %96 : f32 to vector<14x14xf32>
    %98 = arith.mulf %97, %3 : vector<14x14xf32>
    %99 = arith.addf %95, %98 : vector<14x14xf32>
    %c2_63 = arith.constant 2 : index
    %c4_64 = arith.constant 4 : index
    %100 = memref.load %arg1[%c2_63, %c4_64] : memref<3x8xf32, #tpu.memory_space<smem>>
    %101 = vector.broadcast %100 : f32 to vector<14x14xf32>
    %102 = arith.mulf %101, %5 : vector<14x14xf32>
    %103 = arith.addf %99, %102 : vector<14x14xf32>
    %cst_65 = arith.constant 1.200000e+01 : f32
    %cst_66 = arith.constant 3.300000e+01 : f32
    %104 = vector.broadcast %cst_65 : f32 to vector<14x14xf32>
    %105 = arith.maximumf %104, %103 : vector<14x14xf32>
    %106 = vector.broadcast %cst_66 : f32 to vector<14x14xf32>
    %107 = arith.minimumf %106, %105 : vector<14x14xf32>
    %c0_67 = arith.constant 0 : index
    %c4_68 = arith.constant 4 : index
    %c0_69 = arith.constant 0 : index
    %c0_70 = arith.constant 0 : index
    %108 = vector.load %arg3[%c0_67, %c4_68, %c0_69, %c0_70] : memref<2x8x14x14xf32, #tpu.memory_space<vmem>>, vector<1x1x14x14xf32>
    %109 = vector.shape_cast %108 : vector<1x1x14x14xf32> to vector<14x14xf32>
    %110 = vector.shape_cast %107 : vector<14x14xf32> to vector<1x1x14x14xf32>
    tpu.vector_store %arg3[%c0_67, %c4_68, %c0_69, %c0_70], %110 {strides = array<i32>} : memref<2x8x14x14xf32, #tpu.memory_space<vmem>>, vector<1x1x14x14xf32>,
    %c5 = arith.constant 5 : index
    %111 = memref.load %arg2[%c5] : memref<8xf32, #tpu.memory_space<smem>>
    %c0_71 = arith.constant 0 : index
    %c5_72 = arith.constant 5 : index
    %112 = memref.load %arg1[%c0_71, %c5_72] : memref<3x8xf32, #tpu.memory_space<smem>>
    %113 = vector.broadcast %112 : f32 to vector<14x14xf32>
    %114 = arith.mulf %113, %1 : vector<14x14xf32>
    %115 = vector.broadcast %111 : f32 to vector<14x14xf32>
    %116 = arith.addf %115, %114 : vector<14x14xf32>
    %c1_73 = arith.constant 1 : index
    %c5_74 = arith.constant 5 : index
    %117 = memref.load %arg1[%c1_73, %c5_74] : memref<3x8xf32, #tpu.memory_space<smem>>
    %118 = vector.broadcast %117 : f32 to vector<14x14xf32>
    %119 = arith.mulf %118, %3 : vector<14x14xf32>
    %120 = arith.addf %116, %119 : vector<14x14xf32>
    %c2_75 = arith.constant 2 : index
    %c5_76 = arith.constant 5 : index
    %121 = memref.load %arg1[%c2_75, %c5_76] : memref<3x8xf32, #tpu.memory_space<smem>>
    %122 = vector.broadcast %121 : f32 to vector<14x14xf32>
    %123 = arith.mulf %122, %5 : vector<14x14xf32>
    %124 = arith.addf %120, %123 : vector<14x14xf32>
    %cst_77 = arith.constant 1.200000e+01 : f32
    %cst_78 = arith.constant 3.300000e+01 : f32
    %125 = vector.broadcast %cst_77 : f32 to vector<14x14xf32>
    %126 = arith.maximumf %125, %124 : vector<14x14xf32>
    %127 = vector.broadcast %cst_78 : f32 to vector<14x14xf32>
    %128 = arith.minimumf %127, %126 : vector<14x14xf32>
    %c0_79 = arith.constant 0 : index
    %c5_80 = arith.constant 5 : index
    %c0_81 = arith.constant 0 : index
    %c0_82 = arith.constant 0 : index
    %129 = vector.load %arg3[%c0_79, %c5_80, %c0_81, %c0_82] : memref<2x8x14x14xf32, #tpu.memory_space<vmem>>, vector<1x1x14x14xf32>
    %130 = vector.shape_cast %129 : vector<1x1x14x14xf32> to vector<14x14xf32>
    %131 = vector.shape_cast %128 : vector<14x14xf32> to vector<1x1x14x14xf32>
    tpu.vector_store %arg3[%c0_79, %c5_80, %c0_81, %c0_82], %131 {strides = array<i32>} : memref<2x8x14x14xf32, #tpu.memory_space<vmem>>, vector<1x1x14x14xf32>,
    %c6 = arith.constant 6 : index
    %132 = memref.load %arg2[%c6] : memref<8xf32, #tpu.memory_space<smem>>
    %c0_83 = arith.constant 0 : index
    %c6_84 = arith.constant 6 : index
    %133 = memref.load %arg1[%c0_83, %c6_84] : memref<3x8xf32, #tpu.memory_space<smem>>
    %134 = vector.broadcast %133 : f32 to vector<14x14xf32>
    %135 = arith.mulf %134, %1 : vector<14x14xf32>
    %136 = vector.broadcast %132 : f32 to vector<14x14xf32>
    %137 = arith.addf %136, %135 : vector<14x14xf32>
    %c1_85 = arith.constant 1 : index
    %c6_86 = arith.constant 6 : index
    %138 = memref.load %arg1[%c1_85, %c6_86] : memref<3x8xf32, #tpu.memory_space<smem>>
    %139 = vector.broadcast %138 : f32 to vector<14x14xf32>
    %140 = arith.mulf %139, %3 : vector<14x14xf32>
    %141 = arith.addf %137, %140 : vector<14x14xf32>
    %c2_87 = arith.constant 2 : index
    %c6_88 = arith.constant 6 : index
    %142 = memref.load %arg1[%c2_87, %c6_88] : memref<3x8xf32, #tpu.memory_space<smem>>
    %143 = vector.broadcast %142 : f32 to vector<14x14xf32>
    %144 = arith.mulf %143, %5 : vector<14x14xf32>
    %145 = arith.addf %141, %144 : vector<14x14xf32>
    %cst_89 = arith.constant 1.200000e+01 : f32
    %cst_90 = arith.constant 3.300000e+01 : f32
    %146 = vector.broadcast %cst_89 : f32 to vector<14x14xf32>
    %147 = arith.maximumf %146, %145 : vector<14x14xf32>
    %148 = vector.broadcast %cst_90 : f32 to vector<14x14xf32>
    %149 = arith.minimumf %148, %147 : vector<14x14xf32>
    %c0_91 = arith.constant 0 : index
    %c6_92 = arith.constant 6 : index
    %c0_93 = arith.constant 0 : index
    %c0_94 = arith.constant 0 : index
    %150 = vector.load %arg3[%c0_91, %c6_92, %c0_93, %c0_94] : memref<2x8x14x14xf32, #tpu.memory_space<vmem>>, vector<1x1x14x14xf32>
    %151 = vector.shape_cast %150 : vector<1x1x14x14xf32> to vector<14x14xf32>
    %152 = vector.shape_cast %149 : vector<14x14xf32> to vector<1x1x14x14xf32>
    tpu.vector_store %arg3[%c0_91, %c6_92, %c0_93, %c0_94], %152 {strides = array<i32>} : memref<2x8x14x14xf32, #tpu.memory_space<vmem>>, vector<1x1x14x14xf32>,
    %c7 = arith.constant 7 : index
    %153 = memref.load %arg2[%c7] : memref<8xf32, #tpu.memory_space<smem>>
    %c0_95 = arith.constant 0 : index
    %c7_96 = arith.constant 7 : index
    %154 = memref.load %arg1[%c0_95, %c7_96] : memref<3x8xf32, #tpu.memory_space<smem>>
    %155 = vector.broadcast %154 : f32 to vector<14x14xf32>
    %156 = arith.mulf %155, %1 : vector<14x14xf32>
    %157 = vector.broadcast %153 : f32 to vector<14x14xf32>
    %158 = arith.addf %157, %156 : vector<14x14xf32>
    %c1_97 = arith.constant 1 : index
    %c7_98 = arith.constant 7 : index
    %159 = memref.load %arg1[%c1_97, %c7_98] : memref<3x8xf32, #tpu.memory_space<smem>>
    %160 = vector.broadcast %159 : f32 to vector<14x14xf32>
    %161 = arith.mulf %160, %3 : vector<14x14xf32>
    %162 = arith.addf %158, %161 : vector<14x14xf32>
    %c2_99 = arith.constant 2 : index
    %c7_100 = arith.constant 7 : index
    %163 = memref.load %arg1[%c2_99, %c7_100] : memref<3x8xf32, #tpu.memory_space<smem>>
    %164 = vector.broadcast %163 : f32 to vector<14x14xf32>
    %165 = arith.mulf %164, %5 : vector<14x14xf32>
    %166 = arith.addf %162, %165 : vector<14x14xf32>
    %cst_101 = arith.constant 1.200000e+01 : f32
    %cst_102 = arith.constant 3.300000e+01 : f32
    %167 = vector.broadcast %cst_101 : f32 to vector<14x14xf32>
    %168 = arith.maximumf %167, %166 : vector<14x14xf32>
    %169 = vector.broadcast %cst_102 : f32 to vector<14x14xf32>
    %170 = arith.minimumf %169, %168 : vector<14x14xf32>
    %c0_103 = arith.constant 0 : index
    %c7_104 = arith.constant 7 : index
    %c0_105 = arith.constant 0 : index
    %c0_106 = arith.constant 0 : index
    %171 = vector.load %arg3[%c0_103, %c7_104, %c0_105, %c0_106] : memref<2x8x14x14xf32, #tpu.memory_space<vmem>>, vector<1x1x14x14xf32>
    %172 = vector.shape_cast %171 : vector<1x1x14x14xf32> to vector<14x14xf32>
    %173 = vector.shape_cast %170 : vector<14x14xf32> to vector<1x1x14x14xf32>
    tpu.vector_store %arg3[%c0_103, %c7_104, %c0_105, %c0_106], %173 {strides = array<i32>} : memref<2x8x14x14xf32, #tpu.memory_space<vmem>>, vector<1x1x14x14xf32>,
    %c1_107 = arith.constant 1 : index
    %c0_108 = arith.constant 0 : index
    %c1_109 = arith.constant 1 : index
    %c1_110 = arith.constant 1 : index
    %174 = vector.load %arg0[%c1_107, %c0_108, %c1_109, %c1_110] : memref<2x3x16x16xf32, #tpu.memory_space<vmem>>, vector<1x1x14x14xf32>
    %175 = vector.shape_cast %174 : vector<1x1x14x14xf32> to vector<14x14xf32>
    %c1_111 = arith.constant 1 : index
    %c1_112 = arith.constant 1 : index
    %c1_113 = arith.constant 1 : index
    %c1_114 = arith.constant 1 : index
    %176 = vector.load %arg0[%c1_111, %c1_112, %c1_113, %c1_114] : memref<2x3x16x16xf32, #tpu.memory_space<vmem>>, vector<1x1x14x14xf32>
    %177 = vector.shape_cast %176 : vector<1x1x14x14xf32> to vector<14x14xf32>
    %c1_115 = arith.constant 1 : index
    %c2_116 = arith.constant 2 : index
    %c1_117 = arith.constant 1 : index
    %c1_118 = arith.constant 1 : index
    %178 = vector.load %arg0[%c1_115, %c2_116, %c1_117, %c1_118] : memref<2x3x16x16xf32, #tpu.memory_space<vmem>>, vector<1x1x14x14xf32>
    %179 = vector.shape_cast %178 : vector<1x1x14x14xf32> to vector<14x14xf32>
    %c0_119 = arith.constant 0 : index
    %180 = memref.load %arg2[%c0_119] : memref<8xf32, #tpu.memory_space<smem>>
    %c0_120 = arith.constant 0 : index
    %c0_121 = arith.constant 0 : index
    %181 = memref.load %arg1[%c0_120, %c0_121] : memref<3x8xf32, #tpu.memory_space<smem>>
    %182 = vector.broadcast %181 : f32 to vector<14x14xf32>
    %183 = arith.mulf %182, %175 : vector<14x14xf32>
    %184 = vector.broadcast %180 : f32 to vector<14x14xf32>
    %185 = arith.addf %184, %183 : vector<14x14xf32>
    %c1_122 = arith.constant 1 : index
    %c0_123 = arith.constant 0 : index
    %186 = memref.load %arg1[%c1_122, %c0_123] : memref<3x8xf32, #tpu.memory_space<smem>>
    %187 = vector.broadcast %186 : f32 to vector<14x14xf32>
    %188 = arith.mulf %187, %177 : vector<14x14xf32>
    %189 = arith.addf %185, %188 : vector<14x14xf32>
    %c2_124 = arith.constant 2 : index
    %c0_125 = arith.constant 0 : index
    %190 = memref.load %arg1[%c2_124, %c0_125] : memref<3x8xf32, #tpu.memory_space<smem>>
    %191 = vector.broadcast %190 : f32 to vector<14x14xf32>
    %192 = arith.mulf %191, %179 : vector<14x14xf32>
    %193 = arith.addf %189, %192 : vector<14x14xf32>
    %cst_126 = arith.constant 1.200000e+01 : f32
    %cst_127 = arith.constant 3.300000e+01 : f32
    %194 = vector.broadcast %cst_126 : f32 to vector<14x14xf32>
    %195 = arith.maximumf %194, %193 : vector<14x14xf32>
    %196 = vector.broadcast %cst_127 : f32 to vector<14x14xf32>
    %197 = arith.minimumf %196, %195 : vector<14x14xf32>
    %c1_128 = arith.constant 1 : index
    %c0_129 = arith.constant 0 : index
    %c0_130 = arith.constant 0 : index
    %c0_131 = arith.constant 0 : index
    %198 = vector.load %arg3[%c1_128, %c0_129, %c0_130, %c0_131] : memref<2x8x14x14xf32, #tpu.memory_space<vmem>>, vector<1x1x14x14xf32>
    %199 = vector.shape_cast %198 : vector<1x1x14x14xf32> to vector<14x14xf32>
    %200 = vector.shape_cast %197 : vector<14x14xf32> to vector<1x1x14x14xf32>
    tpu.vector_store %arg3[%c1_128, %c0_129, %c0_130, %c0_131], %200 {strides = array<i32>} : memref<2x8x14x14xf32, #tpu.memory_space<vmem>>, vector<1x1x14x14xf32>,
    %c1_132 = arith.constant 1 : index
    %201 = memref.load %arg2[%c1_132] : memref<8xf32, #tpu.memory_space<smem>>
    %c0_133 = arith.constant 0 : index
    %c1_134 = arith.constant 1 : index
    %202 = memref.load %arg1[%c0_133, %c1_134] : memref<3x8xf32, #tpu.memory_space<smem>>
    %203 = vector.broadcast %202 : f32 to vector<14x14xf32>
    %204 = arith.mulf %203, %175 : vector<14x14xf32>
    %205 = vector.broadcast %201 : f32 to vector<14x14xf32>
    %206 = arith.addf %205, %204 : vector<14x14xf32>
    %c1_135 = arith.constant 1 : index
    %c1_136 = arith.constant 1 : index
    %207 = memref.load %arg1[%c1_135, %c1_136] : memref<3x8xf32, #tpu.memory_space<smem>>
    %208 = vector.broadcast %207 : f32 to vector<14x14xf32>
    %209 = arith.mulf %208, %177 : vector<14x14xf32>
    %210 = arith.addf %206, %209 : vector<14x14xf32>
    %c2_137 = arith.constant 2 : index
    %c1_138 = arith.constant 1 : index
    %211 = memref.load %arg1[%c2_137, %c1_138] : memref<3x8xf32, #tpu.memory_space<smem>>
    %212 = vector.broadcast %211 : f32 to vector<14x14xf32>
    %213 = arith.mulf %212, %179 : vector<14x14xf32>
    %214 = arith.addf %210, %213 : vector<14x14xf32>
    %cst_139 = arith.constant 1.200000e+01 : f32
    %cst_140 = arith.constant 3.300000e+01 : f32
    %215 = vector.broadcast %cst_139 : f32 to vector<14x14xf32>
    %216 = arith.maximumf %215, %214 : vector<14x14xf32>
    %217 = vector.broadcast %cst_140 : f32 to vector<14x14xf32>
    %218 = arith.minimumf %217, %216 : vector<14x14xf32>
    %c1_141 = arith.constant 1 : index
    %c1_142 = arith.constant 1 : index
    %c0_143 = arith.constant 0 : index
    %c0_144 = arith.constant 0 : index
    %219 = vector.load %arg3[%c1_141, %c1_142, %c0_143, %c0_144] : memref<2x8x14x14xf32, #tpu.memory_space<vmem>>, vector<1x1x14x14xf32>
    %220 = vector.shape_cast %219 : vector<1x1x14x14xf32> to vector<14x14xf32>
    %221 = vector.shape_cast %218 : vector<14x14xf32> to vector<1x1x14x14xf32>
    tpu.vector_store %arg3[%c1_141, %c1_142, %c0_143, %c0_144], %221 {strides = array<i32>} : memref<2x8x14x14xf32, #tpu.memory_space<vmem>>, vector<1x1x14x14xf32>,
    %c2_145 = arith.constant 2 : index
    %222 = memref.load %arg2[%c2_145] : memref<8xf32, #tpu.memory_space<smem>>
    %c0_146 = arith.constant 0 : index
    %c2_147 = arith.constant 2 : index
    %223 = memref.load %arg1[%c0_146, %c2_147] : memref<3x8xf32, #tpu.memory_space<smem>>
    %224 = vector.broadcast %223 : f32 to vector<14x14xf32>
    %225 = arith.mulf %224, %175 : vector<14x14xf32>
    %226 = vector.broadcast %222 : f32 to vector<14x14xf32>
    %227 = arith.addf %226, %225 : vector<14x14xf32>
    %c1_148 = arith.constant 1 : index
    %c2_149 = arith.constant 2 : index
    %228 = memref.load %arg1[%c1_148, %c2_149] : memref<3x8xf32, #tpu.memory_space<smem>>
    %229 = vector.broadcast %228 : f32 to vector<14x14xf32>
    %230 = arith.mulf %229, %177 : vector<14x14xf32>
    %231 = arith.addf %227, %230 : vector<14x14xf32>
    %c2_150 = arith.constant 2 : index
    %c2_151 = arith.constant 2 : index
    %232 = memref.load %arg1[%c2_150, %c2_151] : memref<3x8xf32, #tpu.memory_space<smem>>
    %233 = vector.broadcast %232 : f32 to vector<14x14xf32>
    %234 = arith.mulf %233, %179 : vector<14x14xf32>
    %235 = arith.addf %231, %234 : vector<14x14xf32>
    %cst_152 = arith.constant 1.200000e+01 : f32
    %cst_153 = arith.constant 3.300000e+01 : f32
    %236 = vector.broadcast %cst_152 : f32 to vector<14x14xf32>
    %237 = arith.maximumf %236, %235 : vector<14x14xf32>
    %238 = vector.broadcast %cst_153 : f32 to vector<14x14xf32>
    %239 = arith.minimumf %238, %237 : vector<14x14xf32>
    %c1_154 = arith.constant 1 : index
    %c2_155 = arith.constant 2 : index
    %c0_156 = arith.constant 0 : index
    %c0_157 = arith.constant 0 : index
    %240 = vector.load %arg3[%c1_154, %c2_155, %c0_156, %c0_157] : memref<2x8x14x14xf32, #tpu.memory_space<vmem>>, vector<1x1x14x14xf32>
    %241 = vector.shape_cast %240 : vector<1x1x14x14xf32> to vector<14x14xf32>
    %242 = vector.shape_cast %239 : vector<14x14xf32> to vector<1x1x14x14xf32>
    tpu.vector_store %arg3[%c1_154, %c2_155, %c0_156, %c0_157], %242 {strides = array<i32>} : memref<2x8x14x14xf32, #tpu.memory_space<vmem>>, vector<1x1x14x14xf32>,
    %c3_158 = arith.constant 3 : index
    %243 = memref.load %arg2[%c3_158] : memref<8xf32, #tpu.memory_space<smem>>
    %c0_159 = arith.constant 0 : index
    %c3_160 = arith.constant 3 : index
    %244 = memref.load %arg1[%c0_159, %c3_160] : memref<3x8xf32, #tpu.memory_space<smem>>
    %245 = vector.broadcast %244 : f32 to vector<14x14xf32>
    %246 = arith.mulf %245, %175 : vector<14x14xf32>
    %247 = vector.broadcast %243 : f32 to vector<14x14xf32>
    %248 = arith.addf %247, %246 : vector<14x14xf32>
    %c1_161 = arith.constant 1 : index
    %c3_162 = arith.constant 3 : index
    %249 = memref.load %arg1[%c1_161, %c3_162] : memref<3x8xf32, #tpu.memory_space<smem>>
    %250 = vector.broadcast %249 : f32 to vector<14x14xf32>
    %251 = arith.mulf %250, %177 : vector<14x14xf32>
    %252 = arith.addf %248, %251 : vector<14x14xf32>
    %c2_163 = arith.constant 2 : index
    %c3_164 = arith.constant 3 : index
    %253 = memref.load %arg1[%c2_163, %c3_164] : memref<3x8xf32, #tpu.memory_space<smem>>
    %254 = vector.broadcast %253 : f32 to vector<14x14xf32>
    %255 = arith.mulf %254, %179 : vector<14x14xf32>
    %256 = arith.addf %252, %255 : vector<14x14xf32>
    %cst_165 = arith.constant 1.200000e+01 : f32
    %cst_166 = arith.constant 3.300000e+01 : f32
    %257 = vector.broadcast %cst_165 : f32 to vector<14x14xf32>
    %258 = arith.maximumf %257, %256 : vector<14x14xf32>
    %259 = vector.broadcast %cst_166 : f32 to vector<14x14xf32>
    %260 = arith.minimumf %259, %258 : vector<14x14xf32>
    %c1_167 = arith.constant 1 : index
    %c3_168 = arith.constant 3 : index
    %c0_169 = arith.constant 0 : index
    %c0_170 = arith.constant 0 : index
    %261 = vector.load %arg3[%c1_167, %c3_168, %c0_169, %c0_170] : memref<2x8x14x14xf32, #tpu.memory_space<vmem>>, vector<1x1x14x14xf32>
    %262 = vector.shape_cast %261 : vector<1x1x14x14xf32> to vector<14x14xf32>
    %263 = vector.shape_cast %260 : vector<14x14xf32> to vector<1x1x14x14xf32>
    tpu.vector_store %arg3[%c1_167, %c3_168, %c0_169, %c0_170], %263 {strides = array<i32>} : memref<2x8x14x14xf32, #tpu.memory_space<vmem>>, vector<1x1x14x14xf32>,
    %c4_171 = arith.constant 4 : index
    %264 = memref.load %arg2[%c4_171] : memref<8xf32, #tpu.memory_space<smem>>
    %c0_172 = arith.constant 0 : index
    %c4_173 = arith.constant 4 : index
    %265 = memref.load %arg1[%c0_172, %c4_173] : memref<3x8xf32, #tpu.memory_space<smem>>
    %266 = vector.broadcast %265 : f32 to vector<14x14xf32>
    %267 = arith.mulf %266, %175 : vector<14x14xf32>
    %268 = vector.broadcast %264 : f32 to vector<14x14xf32>
    %269 = arith.addf %268, %267 : vector<14x14xf32>
    %c1_174 = arith.constant 1 : index
    %c4_175 = arith.constant 4 : index
    %270 = memref.load %arg1[%c1_174, %c4_175] : memref<3x8xf32, #tpu.memory_space<smem>>
    %271 = vector.broadcast %270 : f32 to vector<14x14xf32>
    %272 = arith.mulf %271, %177 : vector<14x14xf32>
    %273 = arith.addf %269, %272 : vector<14x14xf32>
    %c2_176 = arith.constant 2 : index
    %c4_177 = arith.constant 4 : index
    %274 = memref.load %arg1[%c2_176, %c4_177] : memref<3x8xf32, #tpu.memory_space<smem>>
    %275 = vector.broadcast %274 : f32 to vector<14x14xf32>
    %276 = arith.mulf %275, %179 : vector<14x14xf32>
    %277 = arith.addf %273, %276 : vector<14x14xf32>
    %cst_178 = arith.constant 1.200000e+01 : f32
    %cst_179 = arith.constant 3.300000e+01 : f32
    %278 = vector.broadcast %cst_178 : f32 to vector<14x14xf32>
    %279 = arith.maximumf %278, %277 : vector<14x14xf32>
    %280 = vector.broadcast %cst_179 : f32 to vector<14x14xf32>
    %281 = arith.minimumf %280, %279 : vector<14x14xf32>
    %c1_180 = arith.constant 1 : index
    %c4_181 = arith.constant 4 : index
    %c0_182 = arith.constant 0 : index
    %c0_183 = arith.constant 0 : index
    %282 = vector.load %arg3[%c1_180, %c4_181, %c0_182, %c0_183] : memref<2x8x14x14xf32, #tpu.memory_space<vmem>>, vector<1x1x14x14xf32>
    %283 = vector.shape_cast %282 : vector<1x1x14x14xf32> to vector<14x14xf32>
    %284 = vector.shape_cast %281 : vector<14x14xf32> to vector<1x1x14x14xf32>
    tpu.vector_store %arg3[%c1_180, %c4_181, %c0_182, %c0_183], %284 {strides = array<i32>} : memref<2x8x14x14xf32, #tpu.memory_space<vmem>>, vector<1x1x14x14xf32>,
    %c5_184 = arith.constant 5 : index
    %285 = memref.load %arg2[%c5_184] : memref<8xf32, #tpu.memory_space<smem>>
    %c0_185 = arith.constant 0 : index
    %c5_186 = arith.constant 5 : index
    %286 = memref.load %arg1[%c0_185, %c5_186] : memref<3x8xf32, #tpu.memory_space<smem>>
    %287 = vector.broadcast %286 : f32 to vector<14x14xf32>
    %288 = arith.mulf %287, %175 : vector<14x14xf32>
    %289 = vector.broadcast %285 : f32 to vector<14x14xf32>
    %290 = arith.addf %289, %288 : vector<14x14xf32>
    %c1_187 = arith.constant 1 : index
    %c5_188 = arith.constant 5 : index
    %291 = memref.load %arg1[%c1_187, %c5_188] : memref<3x8xf32, #tpu.memory_space<smem>>
    %292 = vector.broadcast %291 : f32 to vector<14x14xf32>
    %293 = arith.mulf %292, %177 : vector<14x14xf32>
    %294 = arith.addf %290, %293 : vector<14x14xf32>
    %c2_189 = arith.constant 2 : index
    %c5_190 = arith.constant 5 : index
    %295 = memref.load %arg1[%c2_189, %c5_190] : memref<3x8xf32, #tpu.memory_space<smem>>
    %296 = vector.broadcast %295 : f32 to vector<14x14xf32>
    %297 = arith.mulf %296, %179 : vector<14x14xf32>
    %298 = arith.addf %294, %297 : vector<14x14xf32>
    %cst_191 = arith.constant 1.200000e+01 : f32
    %cst_192 = arith.constant 3.300000e+01 : f32
    %299 = vector.broadcast %cst_191 : f32 to vector<14x14xf32>
    %300 = arith.maximumf %299, %298 : vector<14x14xf32>
    %301 = vector.broadcast %cst_192 : f32 to vector<14x14xf32>
    %302 = arith.minimumf %301, %300 : vector<14x14xf32>
    %c1_193 = arith.constant 1 : index
    %c5_194 = arith.constant 5 : index
    %c0_195 = arith.constant 0 : index
    %c0_196 = arith.constant 0 : index
    %303 = vector.load %arg3[%c1_193, %c5_194, %c0_195, %c0_196] : memref<2x8x14x14xf32, #tpu.memory_space<vmem>>, vector<1x1x14x14xf32>
    %304 = vector.shape_cast %303 : vector<1x1x14x14xf32> to vector<14x14xf32>
    %305 = vector.shape_cast %302 : vector<14x14xf32> to vector<1x1x14x14xf32>
    tpu.vector_store %arg3[%c1_193, %c5_194, %c0_195, %c0_196], %305 {strides = array<i32>} : memref<2x8x14x14xf32, #tpu.memory_space<vmem>>, vector<1x1x14x14xf32>,
    %c6_197 = arith.constant 6 : index
    %306 = memref.load %arg2[%c6_197] : memref<8xf32, #tpu.memory_space<smem>>
    %c0_198 = arith.constant 0 : index
    %c6_199 = arith.constant 6 : index
    %307 = memref.load %arg1[%c0_198, %c6_199] : memref<3x8xf32, #tpu.memory_space<smem>>
    %308 = vector.broadcast %307 : f32 to vector<14x14xf32>
    %309 = arith.mulf %308, %175 : vector<14x14xf32>
    %310 = vector.broadcast %306 : f32 to vector<14x14xf32>
    %311 = arith.addf %310, %309 : vector<14x14xf32>
    %c1_200 = arith.constant 1 : index
    %c6_201 = arith.constant 6 : index
    %312 = memref.load %arg1[%c1_200, %c6_201] : memref<3x8xf32, #tpu.memory_space<smem>>
    %313 = vector.broadcast %312 : f32 to vector<14x14xf32>
    %314 = arith.mulf %313, %177 : vector<14x14xf32>
    %315 = arith.addf %311, %314 : vector<14x14xf32>
    %c2_202 = arith.constant 2 : index
    %c6_203 = arith.constant 6 : index
    %316 = memref.load %arg1[%c2_202, %c6_203] : memref<3x8xf32, #tpu.memory_space<smem>>
    %317 = vector.broadcast %316 : f32 to vector<14x14xf32>
    %318 = arith.mulf %317, %179 : vector<14x14xf32>
    %319 = arith.addf %315, %318 : vector<14x14xf32>
    %cst_204 = arith.constant 1.200000e+01 : f32
    %cst_205 = arith.constant 3.300000e+01 : f32
    %320 = vector.broadcast %cst_204 : f32 to vector<14x14xf32>
    %321 = arith.maximumf %320, %319 : vector<14x14xf32>
    %322 = vector.broadcast %cst_205 : f32 to vector<14x14xf32>
    %323 = arith.minimumf %322, %321 : vector<14x14xf32>
    %c1_206 = arith.constant 1 : index
    %c6_207 = arith.constant 6 : index
    %c0_208 = arith.constant 0 : index
    %c0_209 = arith.constant 0 : index
    %324 = vector.load %arg3[%c1_206, %c6_207, %c0_208, %c0_209] : memref<2x8x14x14xf32, #tpu.memory_space<vmem>>, vector<1x1x14x14xf32>
    %325 = vector.shape_cast %324 : vector<1x1x14x14xf32> to vector<14x14xf32>
    %326 = vector.shape_cast %323 : vector<14x14xf32> to vector<1x1x14x14xf32>
    tpu.vector_store %arg3[%c1_206, %c6_207, %c0_208, %c0_209], %326 {strides = array<i32>} : memref<2x8x14x14xf32, #tpu.memory_space<vmem>>, vector<1x1x14x14xf32>,
    %c7_210 = arith.constant 7 : index
    %327 = memref.load %arg2[%c7_210] : memref<8xf32, #tpu.memory_space<smem>>
    %c0_211 = arith.constant 0 : index
    %c7_212 = arith.constant 7 : index
    %328 = memref.load %arg1[%c0_211, %c7_212] : memref<3x8xf32, #tpu.memory_space<smem>>
    %329 = vector.broadcast %328 : f32 to vector<14x14xf32>
    %330 = arith.mulf %329, %175 : vector<14x14xf32>
    %331 = vector.broadcast %327 : f32 to vector<14x14xf32>
    %332 = arith.addf %331, %330 : vector<14x14xf32>
    %c1_213 = arith.constant 1 : index
    %c7_214 = arith.constant 7 : index
    %333 = memref.load %arg1[%c1_213, %c7_214] : memref<3x8xf32, #tpu.memory_space<smem>>
    %334 = vector.broadcast %333 : f32 to vector<14x14xf32>
    %335 = arith.mulf %334, %177 : vector<14x14xf32>
    %336 = arith.addf %332, %335 : vector<14x14xf32>
    %c2_215 = arith.constant 2 : index
    %c7_216 = arith.constant 7 : index
    %337 = memref.load %arg1[%c2_215, %c7_216] : memref<3x8xf32, #tpu.memory_space<smem>>
    %338 = vector.broadcast %337 : f32 to vector<14x14xf32>
    %339 = arith.mulf %338, %179 : vector<14x14xf32>
    %340 = arith.addf %336, %339 : vector<14x14xf32>
    %cst_217 = arith.constant 1.200000e+01 : f32
    %cst_218 = arith.constant 3.300000e+01 : f32
    %341 = vector.broadcast %cst_217 : f32 to vector<14x14xf32>
    %342 = arith.maximumf %341, %340 : vector<14x14xf32>
    %343 = vector.broadcast %cst_218 : f32 to vector<14x14xf32>
    %344 = arith.minimumf %343, %342 : vector<14x14xf32>
    %c1_219 = arith.constant 1 : index
    %c7_220 = arith.constant 7 : index
    %c0_221 = arith.constant 0 : index
    %c0_222 = arith.constant 0 : index
    %345 = vector.load %arg3[%c1_219, %c7_220, %c0_221, %c0_222] : memref<2x8x14x14xf32, #tpu.memory_space<vmem>>, vector<1x1x14x14xf32>
    %346 = vector.shape_cast %345 : vector<1x1x14x14xf32> to vector<14x14xf32>
    %347 = vector.shape_cast %344 : vector<14x14xf32> to vector<1x1x14x14xf32>
    tpu.vector_store %arg3[%c1_219, %c7_220, %c0_221, %c0_222], %347 {strides = array<i32>} : memref<2x8x14x14xf32, #tpu.memory_space<vmem>>, vector<1x1x14x14xf32>,
    return
  }
}

</mosaic_0001>

<bundles_post_ra>
// kernel: conv_transpose_1x1_p1_clamp.1
= control target key start
LH: loop header
LB: loop body
LE: loop exit
PB: predicated region body
PF: predicated region fallthrough
CT: control target
= control target key end

     0   :  { %8 = vsyncpa [#allocation3], 0  ;;  %s1378_s0 = inlined_call_operand.hbm [shape: f32[2,3,16,16], index: 0, kind: input, shape index: {}]   ;;  %s1379_s1 = inlined_call_operand.vmem [shape: f32[3,8], index: 1, kind: input, shape index: {}]   ;;  %s1380_s2 = inlined_call_operand.vmem [shape: f32[8], index: 2, kind: input, shape index: {}]   ;;  %s1381_s3 = inlined_call_operand.vmem [shape: f32[2,8,14,14], index: 3, kind: output, shape index: {}]  }
   0x1   :  { %9 = vsyncpa [#allocation4], 0 }
   0x2   :  { %10 = vsyncpa [#allocation7], 0  ;;  %s784_s12 = smov [#allocation2]   ;;  %s29_s16 = sshll.u32 %s1379_s1, 4  ;;  %s30_s16 = int_to_ptr.vmem [resolvable:$true] %s29_s16 }
   0x3   :  { %s16_s13 = sshll.u32 %s784_s12, 4  ;;  %s17_s13 = int_to_ptr.vmem [resolvable:$true] %s16_s13 }
   0x4   :  { %s742_s17 = scalar_lea.vmem %s17_s13, 1536  ;;  %p747_p1 = scmp.lt.s32.totalorder %s17_s13, %s17_s13 }
   0x5   :  { %p743_p0 = scmp.ne.s32.totalorder %s17_s13, %s742_s17  ;;  %p748_p2 = scmp.lt.s32.totalorder %s742_s17, %s742_s17 }
   0x7   :  { %p749_p3 = por %p748_p2, %p747_p1 }
   0x9   :  { %p750_p4 = pnand %p749_p3, %p743_p0 }
   0xb   :  { %753 = shalt.err (!%p750_p4)
}
   0xc   :  { %s785_s18 = smov 128   ;;  %s786_s19 = smov 8  }
   0xd   :  { %22 = dma.hbm_to_vmem [thread:$0]  %s1378_s0, 1536, %s17_s13, [#allocation3], %s785_s18, %s785_s18, %s786_s19  }
   0xe   :  { %s754_s22 = scalar_lea.vmem %s30_s16, 64  ;;  %p759_p6 = scmp.lt.s32.totalorder %s30_s16, %s30_s16 }
   0xf   :  { %p755_p5 = scmp.ne.s32.totalorder %s30_s16, %s754_s22  ;;  %p760_p7 = scmp.lt.s32.totalorder %s754_s22, %s754_s22 }
  0x11   :  { %p761_p8 = por %p760_p7, %p759_p6 }
  0x13   :  { %p762_p9 = pnand %p761_p8, %p755_p5 }
  0x15   :  { %765 = shalt.err (!%p762_p9)
}
  0x16   :  { %s787_s1 = smov [#allocation5]   ;;  %s39_s25 = sshll.u32 %s1380_s2, 4  ;;  %s40_s25 = int_to_ptr.vmem [resolvable:$true] %s39_s25 }
  0x17   :  { %32 = dma.vmem_to_smem %s30_s16, 64, %s787_s1, [#allocation4]  }
  0x18   :  { %s766_s26 = scalar_lea.vmem %s40_s25, 16  ;;  %p771_p11 = scmp.lt.s32.totalorder %s40_s25, %s40_s25 }
  0x19   :  { %p767_p10 = scmp.ne.s32.totalorder %s40_s25, %s766_s26  ;;  %p772_p12 = scmp.lt.s32.totalorder %s766_s26, %s766_s26 }
  0x1b   :  { %p773_p13 = por %p772_p12, %p771_p11 }
  0x1d   :  { %p774_p0 = pnand %p773_p13, %p767_p10 }
  0x1f   :  { %777 = shalt.err (!%p774_p0)
}
  0x20   :  { %s788_s0 = smov [#allocation6]  }
  0x21   :  { %42 = dma.vmem_to_smem %s40_s25, 16, %s788_s0, [#allocation7]  }
  0x22   :  { %778 = dma.done.wait [#allocation3], 1536  }
  0x23   :  { %779 = vsyncadd [#allocation3], 4294965760 }
  0x24   :  { %780 = dma.done.wait [#allocation4], 64  }
  0x25   :  { %781 = vsyncadd [#allocation4], 4294967232 }
  0x26   :  { %782 = dma.done.wait [#allocation7], 16  }
  0x27   :  { %783 = vsyncadd [#allocation7], 4294967280 }
  0x28   :  { %52 = sfence }
  0x29   :  { %s640_s27 = sld [smem:[#allocation6 + $0x1]]  ;;  %v821_v0 = vld [vmem:[#allocation2 + $0x1] sm:$0xff]  ;;  %v823_v1 = vld [vmem:[#allocation2 + $0x9] sm:$0x3f]  ;;  %v825_v2 = vld [vmem:[#allocation2 + $0x11] sm:$0xff]  ;;  %s789_s19 = smov 127  }
  0x2a   :  { %s641_s28 = sld [smem:[#allocation5 + $0x1]]  ;;  %v827_v3 = vld [vmem:[#allocation2 + $0x19] sm:$0x3f]  ;;  %v829_v4 = vld [vmem:[#allocation2 + $0x21] sm:$0xff]  ;;  %v833_v5 = vld [vmem:[#allocation2 + $0x29] sm:$0x3f] }
  0x2b   :  { %s642_s2 = sld [smem:[#allocation5 + $0x81]]  ;;  %v841_v8 = vld [vmem:[#allocation2 + $0x39] sm:$0x3f]  ;;  %v851_v12 = vld [vmem:[#allocation2 + $0x49] sm:$0x3f]  ;;  %vm93_vm0 = vcmask 113664  }
  0x2c   :  { %s643_s29 = sld [smem:[#allocation5 + $0x101]]  ;;  %v873_v22 = vld [vmem:[#allocation2 + $0x59] sm:$0x3f]  ;;  %vm95_vm1 = vcmask 111616  }
  0x2d   :  { %s819_s30 = sld [smem:[#allocation6]] }
  0x2e   :  { %s62_s4 = sld [smem:[#allocation5]] }
  0x2f   :  { %s831_s5 = sld [smem:[#allocation5 + $0x80]]  ;;  %v837_v7 = vstv %s640_s27 }
  0x30   :  { %v835_v6 = vstv %s641_s28  ;;  %s839_s6 = sld [smem:[#allocation5 + $0x100]] }
  0x31   :  { %v100_v9 = vmul.f32 %v835_v6, %v821_v0  ;;  %v101_v10 = vmul.f32 %v835_v6, %v823_v1  ;;  %v847_v11 = vstv %s642_s2  ;;  %s849_s7 = sld [smem:[#allocation6 + $0x2]]  ;;  %v390_v13 = vmul.f32 %v841_v8, %v835_v6 }
  0x32   :  { %v107_v14 = vmul.f32 %v847_v11, %v825_v2  ;;  %v108_v15 = vmul.f32 %v847_v11, %v827_v3  ;;  %v859_v16 = vstv %s643_s29  ;;  %s647_s8 = sld [smem:[#allocation5 + $0x2]]  ;;  %v863_v17 = vmul.f32 %v851_v12, %v847_v11 }
  0x33   :  { %v103_v18 = vadd.f32 %v837_v7, %v100_v9  ;;  %v104_v19 = vadd.f32 %v837_v7, %v101_v10  ;;  %v113_v20 = vmul.f32 %v859_v16, %v829_v4  ;;  %v114_v21 = vmul.f32 %v859_v16, %v833_v5  ;;  %s871_s9 = sld [smem:[#allocation5 + $0x82]] }
  0x34   :  { %v875_v23 = vstv %s62_s4  ;;  %v878_v24 = vstv %s819_s30  ;;  %s880_s10 = sld [smem:[#allocation5 + $0x102]]  ;;  %v883_v25 = vadd.f32 %v390_v13, %v837_v7  ;;  %v887_v26 = vmul.f32 %v873_v22, %v859_v16 }
  0x35   :  { %v109_v27 = vadd.f32 %v107_v14, %v103_v18  ;;  %v64_v28 = vmul.f32 %v875_v23, %v821_v0  ;;  %v65_v29 = vmul.f32 %v875_v23, %v823_v1  ;;  %v894_v30 = vstv %s831_s5  ;;  %s896_s11 = sld [smem:[#allocation6 + $0x3]] }
  0x36   :  { %v71_v31 = vmul.f32 %v894_v30, %v825_v2  ;;  %v72_v32 = vmul.f32 %v894_v30, %v827_v3  ;;  %v903_v33 = vstv %s839_s6  ;;  %v110_v34 = vadd.f32 %v108_v15, %v104_v19  ;;  %s905_s12 = sld [smem:[#allocation5 + $0x3]] }
  0x37   :  { %v115_v35 = vadd.f32 %v113_v20, %v109_v27  ;;  %v67_v36 = vadd.f32 %v878_v24, %v64_v28  ;;  %v68_v37 = vadd.f32 %v878_v24, %v65_v29  ;;  %v77_v38 = vmul.f32 %v903_v33, %v829_v4  ;;  %s911_s13 = sld [smem:[#allocation5 + $0x83]] }
  0x38   :  { %v78_v39 = vmul.f32 %v903_v33, %v833_v5  ;;  %v116_v40 = vadd.f32 %v114_v21, %v110_v34  ;;  %v915_v41 = vstv %s647_s8  ;;  %v918_v42 = vstv %s849_s7  ;;  %s920_s14 = sld [smem:[#allocation5 + $0x103]] }
  0x39   :  { %v117_v43 = vmax.f32 %v115_v35, 12.0  ;;  %v73_v44 = vadd.f32 %v71_v31, %v67_v36  ;;  %v74_v45 = vadd.f32 %v72_v32, %v68_v37  ;;  %v136_v46 = vmul.f32 %v915_v41, %v823_v1  ;;  %s924_s15 = sld [smem:[#allocation6 + $0x4]] }
  0x3a   :  { %v118_v47 = vmax.f32 %v116_v40, 12.0  ;;  %v927_v48 = vstv %s871_s9  ;;  %v930_v49 = vstv %s880_s10  ;;  %v135_v50 = vmul.f32 %v915_v41, %v821_v0  ;;  %s934_s16 = sld [smem:[#allocation5 + $0x4]] }
  0x3b   :  { %v119_v51 = vmin.f32 %v117_v43, 33.0  ;;  %v79_v52 = vadd.f32 %v77_v38, %v73_v44  ;;  %v80_v53 = vadd.f32 %v78_v39, %v74_v45  ;;  %v139_v54 = vadd.f32 %v918_v42, %v136_v46  ;;  %s937_s17 = sld [smem:[#allocation5 + $0x84]] }
  0x3c   :  { %v120_v55 = vmin.f32 %v118_v47, 33.0  ;;  %v143_v56 = vmul.f32 %v927_v48, %v827_v3  ;;  %v149_v57 = vmul.f32 %v930_v49, %v833_v5  ;;  %v138_v58 = vadd.f32 %v918_v42, %v135_v50  ;;  %s944_s18 = sld [smem:[#allocation5 + $0x104]] }
  0x3d   :  { %123 = vrot.lane.b32.xlu1 %v119_v51, %s789_s19  ;;  %v81_v59 = vmax.f32 %v79_v52, 12.0  ;;  %v82_v60 = vmax.f32 %v80_v53, 12.0  ;;  %v142_v61 = vmul.f32 %v927_v48, %v825_v2  ;;  %v148_v62 = vmul.f32 %v930_v49, %v829_v4  ;;  %s960_s20 = sld [smem:[#allocation6 + $0x5]] }
  0x3e   :  { %v145_v63 = vadd.f32 %v143_v56, %v139_v54  ;;  %v952_v9 = vstv %s905_s12  ;;  %v955_v10 = vstv %s896_s11  ;;  %v958_v13 = vstv %s911_s13  ;;  %s964_s21 = sld [smem:[#allocation5 + $0x5]] }
  0x3f   :  { %v83_v14 = vmin.f32 %v81_v59, 33.0  ;;  %v84_v15 = vmin.f32 %v82_v60, 33.0  ;;  %v144_v18 = vadd.f32 %v142_v61, %v138_v58  ;;  %v171_v19 = vmul.f32 %v952_v9, %v823_v1  ;;  %s973_s22 = sld [smem:[#allocation5 + $0x85]] }
  0x40   :  { %v151_v20 = vadd.f32 %v149_v57, %v145_v63  ;;  %v178_v21 = vmul.f32 %v958_v13, %v827_v3  ;;  %v969_v27 = vstv %s920_s14  ;;  %v170_v28 = vmul.f32 %v952_v9, %v821_v0  ;;  %s983_s1 = sld [smem:[#allocation5 + $0x105]] }
  0x41   :  { %87 = vrot.lane.b32.xlu0 %v83_v14, %s789_s19  ;;  %125 = vrot.lane.b32.xlu1 %v120_v55, %s789_s19  ;;  %v150_v29 = vadd.f32 %v148_v62, %v144_v18  ;;  %v174_v31 = vadd.f32 %v955_v10, %v171_v19  ;;  %v184_v32 = vmul.f32 %v969_v27, %v833_v5  ;;  %v981_v34 = vstv %s934_s16  ;;  %s995_s23 = sld [smem:[#allocation6 + $0x6]] }
  0x42   :  { %v153_v35 = vmax.f32 %v151_v20, 12.0  ;;  %v173_v36 = vadd.f32 %v955_v10, %v170_v28  ;;  %v177_v37 = vmul.f32 %v958_v13, %v825_v2  ;;  %v183_v38 = vmul.f32 %v969_v27, %v829_v4  ;;  %s1003_s24 = sld [smem:[#allocation5 + $0x6]] }
  0x43   :  { %v152_v39 = vmax.f32 %v150_v29, 12.0  ;;  %v180_v40 = vadd.f32 %v178_v21, %v174_v31  ;;  %v206_v43 = vmul.f32 %v981_v34, %v823_v1  ;;  %v993_v44 = vstv %s924_s15  ;;  %s1009_s25 = sld [smem:[#allocation5 + $0x86]] }
  0x44   :  { %v155_v45 = vmin.f32 %v153_v35, 33.0  ;;  %v179_v46 = vadd.f32 %v177_v37, %v173_v36  ;;  %v998_v47 = vstv %s937_s17  ;;  %v1001_v50 = vstv %s944_s18  ;;  %s1018_s26 = sld [smem:[#allocation5 + $0x106]] }
  0x45   :  { %89 = vrot.lane.b32.xlu0 %v84_v15, %s789_s19  ;;  %v154_v51 = vmin.f32 %v152_v39, 33.0  ;;  %v186_v52 = vadd.f32 %v184_v32, %v180_v40  ;;  %v209_v53 = vadd.f32 %v993_v44, %v206_v43  ;;  %v213_v54 = vmul.f32 %v998_v47, %v827_v3  ;;  %s1031_s0 = sld [smem:[#allocation6 + $0x7]] }
  0x46   :  { %160 = vrot.lane.b32.xlu1 %v155_v45, %s789_s19  ;;  %v185_v55 = vadd.f32 %v183_v38, %v179_v46  ;;  %v219_v56 = vmul.f32 %v1001_v50, %v833_v5  ;;  %v205_v57 = vmul.f32 %v981_v34, %v821_v0  ;;  %v212_v58 = vmul.f32 %v998_v47, %v825_v2  ;;  %s1040_s27 = sld [smem:[#allocation5 + $0x7]] }
  0x47   :  { %v188_v59 = vmax.f32 %v186_v52, 12.0  ;;  %v215_v60 = vadd.f32 %v213_v54, %v209_v53  ;;  %v218_v61 = vmul.f32 %v1001_v50, %v829_v4  ;;  %v1023_v62 = vstv %s964_s21  ;;  %s1045_s28 = sld [smem:[#allocation5 + $0x87]] }
  0x48   :  { %v187_v63 = vmax.f32 %v185_v55, 12.0  ;;  %v208_v14 = vadd.f32 %v993_v44, %v205_v57  ;;  %v241_v15 = vmul.f32 %v1023_v62, %v823_v1  ;;  %v1029_v18 = vstv %s960_s20  ;;  %s1054_s2 = sld [smem:[#allocation5 + $0x107]] }
  0x49   :  { %158 = vrot.lane.b32.xlu0 %v154_v51, %s789_s19  ;;  %v190_v19 = vmin.f32 %v188_v59, 33.0  ;;  %v221_v20 = vadd.f32 %v219_v56, %v215_v60  ;;  %v1035_v21 = vstv %s973_s22  ;;  %v1038_v28 = vstv %s983_s1 }
  0x4a   :  { %v189_v29 = vmin.f32 %v187_v63, 33.0  ;;  %v214_v31 = vadd.f32 %v212_v58, %v208_v14  ;;  %v244_v32 = vadd.f32 %v1029_v18, %v241_v15  ;;  %v248_v35 = vmul.f32 %v1035_v21, %v827_v3 }
  0x4b   :  { %195 = vrot.lane.b32.xlu1 %v190_v19, %s789_s19  ;;  %v223_v36 = vmax.f32 %v221_v20, 12.0  ;;  %v254_v37 = vmul.f32 %v1038_v28, %v833_v5  ;;  %v240_v38 = vmul.f32 %v1023_v62, %v821_v0  ;;  %v247_v39 = vmul.f32 %v1035_v21, %v825_v2 }
  0x4c   :  { %v220_v40 = vadd.f32 %v218_v61, %v214_v31  ;;  %v250_v43 = vadd.f32 %v248_v35, %v244_v32  ;;  %v253_v45 = vmul.f32 %v1038_v28, %v829_v4  ;;  %v1059_v46 = vstv %s1003_s24 }
  0x4d   :  { %193 = vrot.lane.b32.xlu0 %v189_v29, %s789_s19  ;;  %v225_v51 = vmin.f32 %v223_v36, 33.0  ;;  %v243_v52 = vadd.f32 %v1029_v18, %v240_v38  ;;  %v276_v53 = vmul.f32 %v1059_v46, %v823_v1  ;;  %v1066_v54 = vstv %s995_s23 }
  0x4e   :  { %v222_v55 = vmax.f32 %v220_v40, 12.0  ;;  %v256_v56 = vadd.f32 %v254_v37, %v250_v43  ;;  %v1069_v57 = vstv %s1009_s25  ;;  %v1072_v58 = vstv %s1018_s26 }
  0x4f   :  { %230 = vrot.lane.b32.xlu1 %v225_v51, %s789_s19  ;;  %v249_v59 = vadd.f32 %v247_v39, %v243_v52  ;;  %v279_v60 = vadd.f32 %v1066_v54, %v276_v53  ;;  %v283_v61 = vmul.f32 %v1069_v57, %v827_v3  ;;  %v289_v63 = vmul.f32 %v1072_v58, %v833_v5 }
  0x50   :  { %v224_v14 = vmin.f32 %v222_v55, 33.0  ;;  %v258_v15 = vmax.f32 %v256_v56, 12.0  ;;  %v275_v19 = vmul.f32 %v1059_v46, %v821_v0  ;;  %v282_v20 = vmul.f32 %v1069_v57, %v825_v2 }
  0x51   :  { %v255_v29 = vadd.f32 %v253_v45, %v249_v59  ;;  %v285_v31 = vadd.f32 %v283_v61, %v279_v60  ;;  %v288_v32 = vmul.f32 %v1072_v58, %v829_v4  ;;  %v1087_v35 = vstv %s1040_s27 }
  0x52   :  { %228 = vrot.lane.b32.xlu0 %v224_v14, %s789_s19  ;;  %v260_v36 = vmin.f32 %v258_v15, 33.0  ;;  %v278_v37 = vadd.f32 %v1066_v54, %v275_v19  ;;  %v311_v38 = vmul.f32 %v1087_v35, %v823_v1  ;;  %v1094_v39 = vstv %s1031_s0 }
  0x53   :  { %v257_v40 = vmax.f32 %v255_v29, 12.0  ;;  %v291_v43 = vadd.f32 %v289_v63, %v285_v31  ;;  %v1097_v51 = vstv %s1045_s28  ;;  %v1100_v45 = vstv %s1054_s2  ;;  %v1112_v63 = vld [vmem:[#allocation2 + $0x31] sm:$0xff] }
  0x54   :  { %265 = vrot.lane.b32.xlu1 %v260_v36, %s789_s19  ;;  %v284_v52 = vadd.f32 %v282_v20, %v278_v37  ;;  %v314_v53 = vadd.f32 %v1094_v39, %v311_v38  ;;  %v318_v55 = vmul.f32 %v1097_v51, %v827_v3  ;;  %v324_v56 = vmul.f32 %v1100_v45, %v833_v5  ;;  %v1118_v20 = vld [vmem:[#allocation2 + $0x41] sm:$0xff]  ;;  %v1120_v5 = vld [vmem:[#allocation2 + $0x51] sm:$0xff] }
  0x55   :  { %v259_v1 = vmin.f32 %v257_v40, 33.0  ;;  %v293_v59 = vmax.f32 %v291_v43, 12.0  ;;  %v310_v60 = vmul.f32 %v1087_v35, %v821_v0  ;;  %v317_v61 = vmul.f32 %v1097_v51, %v825_v2 }
  0x56   :  { %v290_v14 = vadd.f32 %v288_v32, %v284_v52  ;;  %v320_v15 = vadd.f32 %v318_v55, %v314_v53  ;;  %v323_v19 = vmul.f32 %v1100_v45, %v829_v4  ;;  %v355_v3 = vmul.f32 %v841_v8, %v875_v23 }
  0x57   :  { %263 = vrot.lane.b32.xlu0 %v259_v1, %s789_s19  ;;  %v295_v0 = vmin.f32 %v293_v59, 33.0  ;;  %v313_v29 = vadd.f32 %v1094_v39, %v310_v60  ;;  %v362_v2 = vmul.f32 %v851_v12, %v894_v30  ;;  %v368_v31 = vmul.f32 %v873_v22, %v903_v33 }
  0x58   :  { %v292_v32 = vmax.f32 %v290_v14, 12.0  ;;  %v326_v4 = vadd.f32 %v324_v56, %v320_v15  ;;  %v358_v36 = vadd.f32 %v355_v3, %v878_v24  ;;  %v354_v37 = vmul.f32 %v1112_v63, %v875_v23 }
  0x59   :  { %300 = vrot.lane.b32.xlu1 %v295_v0, %s789_s19  ;;  %v319_v38 = vadd.f32 %v317_v61, %v313_v29  ;;  %v361_v40 = vmul.f32 %v1118_v20, %v894_v30  ;;  %v367_v43 = vmul.f32 %v1120_v5, %v903_v33  ;;  %v399_v52 = vadd.f32 %v863_v17, %v883_v25 }
  0x5a   :  { %v294_v53 = vmin.f32 %v292_v32, 33.0  ;;  %v328_v55 = vmax.f32 %v326_v4, 12.0  ;;  %v364_v56 = vadd.f32 %v362_v2, %v358_v36  ;;  %v357_v1 = vadd.f32 %v354_v37, %v878_v24 }
  0x5b   :  { %v325_v59 = vadd.f32 %v323_v19, %v319_v38  ;;  %v405_v23 = vadd.f32 %v887_v26, %v399_v52  ;;  %v389_v60 = vmul.f32 %v1112_v63, %v835_v6  ;;  %v396_v30 = vmul.f32 %v1118_v20, %v847_v11 }
  0x5c   :  { %298 = vrot.lane.b32.xlu0 %v294_v53, %s789_s19  ;;  %v330_v33 = vmin.f32 %v328_v55, 33.0  ;;  %v370_v61 = vadd.f32 %v368_v31, %v364_v56  ;;  %v363_v14 = vadd.f32 %v361_v40, %v357_v1  ;;  %v402_v17 = vmul.f32 %v1120_v5, %v859_v16 }
  0x5d   :  { %v327_v25 = vmax.f32 %v325_v59, 12.0  ;;  %v407_v15 = vmax.f32 %v405_v23, 12.0  ;;  %v392_v24 = vadd.f32 %v389_v60, %v837_v7  ;;  %v425_v26 = vmul.f32 %v841_v8, %v915_v41 }
  0x5e   :  { %335 = vrot.lane.b32.xlu1 %v330_v33, %s789_s19  ;;  %v372_v6 = vmax.f32 %v370_v61, 12.0  ;;  %v369_v19 = vadd.f32 %v367_v43, %v363_v14  ;;  %v432_v11 = vmul.f32 %v851_v12, %v927_v48  ;;  %v438_v3 = vmul.f32 %v873_v22, %v930_v49 }
  0x5f   :  { %v329_v0 = vmin.f32 %v327_v25, 33.0  ;;  %v409_v29 = vmin.f32 %v407_v15, 33.0  ;;  %v398_v16 = vadd.f32 %v396_v30, %v392_v24  ;;  %v428_v2 = vadd.f32 %v425_v26, %v918_v42 }
  0x60   :  { %v374_v31 = vmin.f32 %v372_v6, 33.0  ;;  %v371_v7 = vmax.f32 %v369_v19, 12.0  ;;  %v424_v32 = vmul.f32 %v1112_v63, %v915_v41  ;;  %v431_v4 = vmul.f32 %v1118_v20, %v927_v48 }
  0x61   :  { %333 = vrot.lane.b32.xlu0 %v329_v0, %s789_s19  ;;  %v404_v36 = vadd.f32 %v402_v17, %v398_v16  ;;  %v434_v37 = vadd.f32 %v432_v11, %v428_v2  ;;  %v437_v38 = vmul.f32 %v1120_v5, %v930_v49  ;;  %v460_v40 = vmul.f32 %v841_v8, %v952_v9 }
  0x62   :  { %379 = vrot.lane.b32.xlu1 %v374_v31, %s789_s19  ;;  %v373_v43 = vmin.f32 %v371_v7, 33.0  ;;  %v427_v52 = vadd.f32 %v424_v32, %v918_v42  ;;  %v467_v41 = vmul.f32 %v851_v12, %v958_v13  ;;  %v473_v48 = vmul.f32 %v873_v22, %v969_v27 }
  0x63   :  { %v406_v53 = vmax.f32 %v404_v36, 12.0  ;;  %v440_v55 = vadd.f32 %v438_v3, %v434_v37  ;;  %v463_v56 = vadd.f32 %v460_v40, %v955_v10  ;;  %v459_v49 = vmul.f32 %v1112_v63, %v952_v9 }
  0x64   :  { %v433_v1 = vadd.f32 %v431_v4, %v427_v52  ;;  %v466_v59 = vmul.f32 %v1118_v20, %v958_v13  ;;  %v472_v42 = vmul.f32 %v1120_v5, %v969_v27  ;;  %v495_v23 = vmul.f32 %v841_v8, %v981_v34 }
  0x65   :  { %377 = vrot.lane.b32.xlu0 %v373_v43, %s789_s19  ;;  %v408_v60 = vmin.f32 %v406_v53, 33.0  ;;  %v442_v30 = vmax.f32 %v440_v55, 12.0  ;;  %v469_v33 = vadd.f32 %v467_v41, %v463_v56  ;;  %v462_v61 = vadd.f32 %v459_v49, %v955_v10 }
  0x66   :  { %414 = vrot.lane.b32.xlu1 %v409_v29, %s789_s19  ;;  %v439_v9 = vadd.f32 %v437_v38, %v433_v1  ;;  %v498_v14 = vadd.f32 %v495_v23, %v993_v44  ;;  %v502_v13 = vmul.f32 %v851_v12, %v998_v47  ;;  %v508_v27 = vmul.f32 %v873_v22, %v1001_v50 }
  0x67   :  { %v444_v17 = vmin.f32 %v442_v30, 33.0  ;;  %v475_v25 = vadd.f32 %v473_v48, %v469_v33  ;;  %v468_v15 = vadd.f32 %v466_v59, %v462_v61  ;;  %v494_v24 = vmul.f32 %v1112_v63, %v981_v34 }
  0x68   :  { %v441_v26 = vmax.f32 %v439_v9, 12.0  ;;  %v504_v6 = vadd.f32 %v502_v13, %v498_v14  ;;  %v501_v10 = vmul.f32 %v1118_v20, %v998_v47  ;;  %v507_v19 = vmul.f32 %v1120_v5, %v1001_v50 }
  0x69   :  { %412 = vrot.lane.b32.xlu0 %v408_v60, %s789_s19  ;;  %v477_v11 = vmax.f32 %v475_v25, 12.0  ;;  %v474_v3 = vadd.f32 %v472_v42, %v468_v15  ;;  %v497_v0 = vadd.f32 %v494_v24, %v993_v44  ;;  %v530_v29 = vmul.f32 %v841_v8, %v1023_v62 }
  0x6a   :  { %449 = vrot.lane.b32.xlu1 %v444_v17, %s789_s19  ;;  %v443_v34 = vmin.f32 %v441_v26, 33.0  ;;  %v510_v16 = vadd.f32 %v508_v27, %v504_v6  ;;  %v537_v2 = vmul.f32 %v851_v12, %v1035_v21  ;;  %v543_v47 = vmul.f32 %v873_v22, %v1038_v28 }
  0x6b   :  { %v479_v50 = vmin.f32 %v477_v11, 33.0  ;;  %v476_v31 = vmax.f32 %v474_v3, 12.0  ;;  %v503_v7 = vadd.f32 %v501_v10, %v497_v0  ;;  %v533_v32 = vadd.f32 %v530_v29, %v1029_v18 }
  0x6c   :  { %v512_v4 = vmax.f32 %v510_v16, 12.0  ;;  %v529_v44 = vmul.f32 %v1112_v63, %v1023_v62  ;;  %v536_v36 = vmul.f32 %v1118_v20, %v1035_v21  ;;  %v542_v37 = vmul.f32 %v1120_v5, %v1038_v28 }
  0x6d   :  { %447 = vrot.lane.b32.xlu0 %v443_v34, %s789_s19  ;;  %v478_v38 = vmin.f32 %v476_v31, 33.0  ;;  %v509_v40 = vadd.f32 %v507_v19, %v503_v7  ;;  %v539_v43 = vadd.f32 %v537_v2, %v533_v32  ;;  %v565_v52 = vmul.f32 %v841_v8, %v1059_v46 }
  0x6e   :  { %484 = vrot.lane.b32.xlu1 %v479_v50, %s789_s19  ;;  %v514_v41 = vmin.f32 %v512_v4, 33.0  ;;  %v532_v48 = vadd.f32 %v529_v44, %v1029_v18  ;;  %v572_v62 = vmul.f32 %v851_v12, %v1069_v57  ;;  %v578_v21 = vmul.f32 %v873_v22, %v1072_v58 }
  0x6f   :  { %v511_v28 = vmax.f32 %v509_v40, 12.0  ;;  %v545_v53 = vadd.f32 %v543_v47, %v539_v43  ;;  %v568_v55 = vadd.f32 %v565_v52, %v1066_v54  ;;  %v564_v56 = vmul.f32 %v1112_v63, %v1059_v46 }
  0x70   :  { %v538_v49 = vadd.f32 %v536_v36, %v532_v48  ;;  %v571_v1 = vmul.f32 %v1118_v20, %v1069_v57  ;;  %v577_v18 = vmul.f32 %v1120_v5, %v1072_v58  ;;  %v600_v59 = vmul.f32 %v841_v8, %v1087_v35 }
  0x71   :  { %482 = vrot.lane.b32.xlu0 %v478_v38, %s789_s19  ;;  %v513_v42 = vmin.f32 %v511_v28, 33.0  ;;  %v547_v23 = vmax.f32 %v545_v53, 12.0  ;;  %v574_v60 = vadd.f32 %v572_v62, %v568_v55  ;;  %v567_v30 = vadd.f32 %v564_v56, %v1066_v54 }
  0x72   :  { %519 = vrot.lane.b32.xlu1 %v514_v41, %s789_s19  ;;  %v544_v46 = vadd.f32 %v542_v37, %v538_v49  ;;  %v603_v33 = vadd.f32 %v600_v59, %v1094_v39  ;;  %v607_v57 = vmul.f32 %v851_v12, %v1097_v51  ;;  %v613_v58 = vmul.f32 %v873_v22, %v1100_v45 }
  0x73   :  { %v549_v61 = vmin.f32 %v547_v23, 33.0  ;;  %v580_v8 = vadd.f32 %v578_v21, %v574_v60  ;;  %v573_v9 = vadd.f32 %v571_v1, %v567_v30  ;;  %v599_v14 = vmul.f32 %v1112_v63, %v1087_v35 }
  0x74   :  { %v546_v13 = vmax.f32 %v544_v46, 12.0  ;;  %v609_v27 = vadd.f32 %v607_v57, %v603_v33  ;;  %v606_v54 = vmul.f32 %v1118_v20, %v1097_v51  ;;  %v612_v22 = vmul.f32 %v1120_v5, %v1100_v45 }
  0x75   :  { %517 = vrot.lane.b32.xlu0 %v513_v42, %s789_s19  ;;  %v582_v17 = vmax.f32 %v580_v8, 12.0  ;;  %v579_v25 = vadd.f32 %v577_v18, %v573_v9  ;;  %v602_v12 = vadd.f32 %v599_v14, %v1094_v39 }
  0x76   :  { %554 = vrot.lane.b32.xlu1 %v549_v61, %s789_s19  ;;  %v548_v15 = vmin.f32 %v546_v13, 33.0  ;;  %v615_v24 = vadd.f32 %v613_v58, %v609_v27 }
  0x77   :  { %v584_v26 = vmin.f32 %v582_v17, 33.0  ;;  %v581_v35 = vmax.f32 %v579_v25, 12.0  ;;  %v608_v63 = vadd.f32 %v606_v54, %v602_v12 }
  0x78   :  { %v617_v6 = vmax.f32 %v615_v24, 12.0 }
  0x79   :  { %552 = vrot.lane.b32.xlu0 %v548_v15, %s789_s19  ;;  %v583_v51 = vmin.f32 %v581_v35, 33.0  ;;  %v614_v20 = vadd.f32 %v612_v22, %v608_v63 }
  0x7a   :  { %589 = vrot.lane.b32.xlu1 %v584_v26, %s789_s19  ;;  %v619_v10 = vmin.f32 %v617_v6, 33.0 }
  0x7b   :  { %v616_v19 = vmax.f32 %v614_v20, 12.0 }
  0x7d   :  { %587 = vrot.lane.b32.xlu0 %v583_v51, %s789_s19  ;;  %v618_v39 = vmin.f32 %v616_v19, 33.0 }
  0x7e   :  { %624 = vrot.lane.b32.xlu1 %v619_v10, %s789_s19 }
  0x81   :  { %622 = vrot.lane.b32.xlu0 %v618_v39, %s789_s19 }
  0xaf   :  { %v124_v45 = vpop.permute.xlu1 %123 }
  0xb0   :  { %644 = vst.msk [vmem:[%s1381_s3 + $0x10] sm:$0xff] %vm93_vm0, %v124_v45 }
  0xb3   :  { %v88_v5 = vpop.permute.xlu0 %87  ;;  %v126_v11 = vpop.permute.xlu1 %125 }
  0xb4   :  { %94 = vst.msk [vmem:[%s1381_s3] sm:$0xff] %vm93_vm0, %v88_v5 }
  0xb5   :  { %645 = vst.msk [vmem:[%s1381_s3 + $0x18] sm:$0x3f] %vm95_vm1, %v126_v11 }
  0xb7   :  { %v90_v3 = vpop.permute.xlu0 %89 }
  0xb8   :  { %96 = vst.msk [vmem:[%s1381_s3 + $0x8] sm:$0x3f] %vm95_vm1, %v90_v3  ;;  %v161_v0 = vpop.permute.xlu1 %160 }
  0xb9   :  { %651 = vst.msk [vmem:[%s1381_s3 + $0x28] sm:$0x3f] %vm95_vm1, %v161_v0 }
  0xbb   :  { %v159_v29 = vpop.permute.xlu0 %158 }
  0xbc   :  { %650 = vst.msk [vmem:[%s1381_s3 + $0x20] sm:$0xff] %vm93_vm0, %v159_v29 }
  0xbd   :  { %v196_v34 = vpop.permute.xlu1 %195 }
  0xbe   :  { %657 = vst.msk [vmem:[%s1381_s3 + $0x38] sm:$0x3f] %vm95_vm1, %v196_v34 }
  0xbf   :  { %v194_v16 = vpop.permute.xlu0 %193 }
  0xc0   :  { %656 = vst.msk [vmem:[%s1381_s3 + $0x30] sm:$0xff] %vm93_vm0, %v194_v16 }
  0xc1   :  { %v231_v2 = vpop.permute.xlu1 %230 }
  0xc2   :  { %663 = vst.msk [vmem:[%s1381_s3 + $0x48] sm:$0x3f] %vm95_vm1, %v231_v2 }
  0xc4   :  { %v229_v47 = vpop.permute.xlu0 %228 }
  0xc5   :  { %662 = vst.msk [vmem:[%s1381_s3 + $0x40] sm:$0xff] %vm93_vm0, %v229_v47 }
  0xc6   :  { %v266_v50 = vpop.permute.xlu1 %265 }
  0xc7   :  { %669 = vst.msk [vmem:[%s1381_s3 + $0x58] sm:$0x3f] %vm95_vm1, %v266_v50 }
  0xc9   :  { %v264_v31 = vpop.permute.xlu0 %263 }
  0xca   :  { %668 = vst.msk [vmem:[%s1381_s3 + $0x50] sm:$0xff] %vm93_vm0, %v264_v31 }
  0xcb   :  { %v301_v7 = vpop.permute.xlu1 %300 }
  0xcc   :  { %675 = vst.msk [vmem:[%s1381_s3 + $0x68] sm:$0x3f] %vm95_vm1, %v301_v7 }
  0xce   :  { %v299_v32 = vpop.permute.xlu0 %298 }
  0xcf   :  { %674 = vst.msk [vmem:[%s1381_s3 + $0x60] sm:$0xff] %vm93_vm0, %v299_v32 }
  0xd0   :  { %v336_v4 = vpop.permute.xlu1 %335 }
  0xd1   :  { %681 = vst.msk [vmem:[%s1381_s3 + $0x78] sm:$0x3f] %vm95_vm1, %v336_v4 }
  0xd3   :  { %v334_v44 = vpop.permute.xlu0 %333 }
  0xd4   :  { %680 = vst.msk [vmem:[%s1381_s3 + $0x70] sm:$0xff] %vm93_vm0, %v334_v44  ;;  %v380_v36 = vpop.permute.xlu1 %379 }
  0xd5   :  { %685 = vst.msk [vmem:[%s1381_s3 + $0x88] sm:$0x3f] %vm95_vm1, %v380_v36 }
  0xd7   :  { %v378_v37 = vpop.permute.xlu0 %377 }
  0xd8   :  { %684 = vst.msk [vmem:[%s1381_s3 + $0x80] sm:$0xff] %vm93_vm0, %v378_v37  ;;  %v415_v38 = vpop.permute.xlu1 %414 }
  0xd9   :  { %691 = vst.msk [vmem:[%s1381_s3 + $0x98] sm:$0x3f] %vm95_vm1, %v415_v38 }
  0xdb   :  { %v413_v40 = vpop.permute.xlu0 %412 }
  0xdc   :  { %690 = vst.msk [vmem:[%s1381_s3 + $0x90] sm:$0xff] %vm93_vm0, %v413_v40  ;;  %v450_v43 = vpop.permute.xlu1 %449 }
  0xdd   :  { %697 = vst.msk [vmem:[%s1381_s3 + $0xa8] sm:$0x3f] %vm95_vm1, %v450_v43 }
  0xdf   :  { %v448_v52 = vpop.permute.xlu0 %447 }
  0xe0   :  { %696 = vst.msk [vmem:[%s1381_s3 + $0xa0] sm:$0xff] %vm93_vm0, %v448_v52  ;;  %v485_v41 = vpop.permute.xlu1 %484 }
  0xe1   :  { %703 = vst.msk [vmem:[%s1381_s3 + $0xb8] sm:$0x3f] %vm95_vm1, %v485_v41 }
  0xe3   :  { %v483_v48 = vpop.permute.xlu0 %482 }
  0xe4   :  { %702 = vst.msk [vmem:[%s1381_s3 + $0xb0] sm:$0xff] %vm93_vm0, %v483_v48  ;;  %v520_v62 = vpop.permute.xlu1 %519 }
  0xe5   :  { %709 = vst.msk [vmem:[%s1381_s3 + $0xc8] sm:$0x3f] %vm95_vm1, %v520_v62 }
  0xe7   :  { %v518_v21 = vpop.permute.xlu0 %517 }
  0xe8   :  { %708 = vst.msk [vmem:[%s1381_s3 + $0xc0] sm:$0xff] %vm93_vm0, %v518_v21  ;;  %v555_v28 = vpop.permute.xlu1 %554 }
  0xe9   :  { %715 = vst.msk [vmem:[%s1381_s3 + $0xd8] sm:$0x3f] %vm95_vm1, %v555_v28 }
  0xeb   :  { %v553_v53 = vpop.permute.xlu0 %552 }
  0xec   :  { %714 = vst.msk [vmem:[%s1381_s3 + $0xd0] sm:$0xff] %vm93_vm0, %v553_v53  ;;  %v590_v55 = vpop.permute.xlu1 %589 }
  0xed   :  { %721 = vst.msk [vmem:[%s1381_s3 + $0xe8] sm:$0x3f] %vm95_vm1, %v590_v55 }
  0xef   :  { %v588_v56 = vpop.permute.xlu0 %587 }
  0xf0   :  { %720 = vst.msk [vmem:[%s1381_s3 + $0xe0] sm:$0xff] %vm93_vm0, %v588_v56  ;;  %v625_v49 = vpop.permute.xlu1 %624 }
  0xf1   :  { %727 = vst.msk [vmem:[%s1381_s3 + $0xf8] sm:$0x3f] %vm95_vm1, %v625_v49 }
  0xf3   :  { %v623_v1 = vpop.permute.xlu0 %622 }
  0xf4   :  { %726 = vst.msk [vmem:[%s1381_s3 + $0xf0] sm:$0xff] %vm93_vm0, %v623_v1 }
  0xf5   :  { %635 = vsyncpa [#allocation3], 1 }
  0xf6   :  { %636 = vsyncpa [#allocation4], 1 }
  0xf7   :  { %637 = vsyncpa [#allocation7], 1 }

</bundles_post_ra>
